<compile_context>
chip_gen: v6e
topology: v6e:2x2x1
jax: 0.10.0
libtpu: 0.0.40
codegen_flags: <defaults>
</compile_context>

<pallas_src>
import functools

import jax
import jax.numpy as jnp
from jax.experimental import pallas as pl
from jax.experimental.pallas import tpu as pltpu


def _layernorm_kernel(alpha_ref, bias_ref, x_ref, o_ref, *, eps, d_model):
    # x_ref: (row_tile, d_model) block in VMEM
    x = x_ref[...].astype(jnp.float32)

    # Fused single-pass statistics: sum(x) and sum(x*x).
    s1 = jnp.sum(x, axis=-1, keepdims=True)          # (row_tile, 1)
    s2 = jnp.sum(x * x, axis=-1, keepdims=True)      # (row_tile, 1)
    mean = s1 * (1.0 / d_model)
    # torch.Tensor.std defaults to the unbiased estimator (divide by N-1):
    # var = (sum(x^2) - sum(x)^2 / d) / (d - 1)
    var = (s2 - s1 * mean) * (1.0 / (d_model - 1))
    var = jnp.maximum(var, 0.0)                      # guard tiny negatives
    std = jnp.sqrt(var)

    # Per-row scale/shift computed on the (row_tile, 1) column only; full-tile
    # work below is a single multiply + add.
    # approx=False keeps accuracy well inside the 1e-5 reference tolerance.
    inv = pl.reciprocal(std + eps, approx=False)     # (row_tile, 1)
    alpha = alpha_ref[0]
    bias = bias_ref[0]
    scale = alpha * inv                              # (row_tile, 1)
    shift = bias - mean * scale                      # (row_tile, 1)

    o_ref[...] = (x * scale + shift).astype(o_ref.dtype)


def _choose_row_tile(rows, d, dtype):
    """Pick a large, VMEM-safe, sublane-packed row tile."""
    itemsize = jnp.dtype(dtype).itemsize
    # sublane packing: 8 rows for 4-byte, 16 for 2-byte, 32 for 1-byte dtypes
    packing = max(8, 32 // max(1, itemsize))
    # VMEM budget: ~2x double-buffered input + 2x output = 4 * tile_bytes, plus
    # f32 compute temporaries. Stay well under the smallest default scoped VMEM
    # limit (v5e: 16 MiB; v7x: 32 MiB of 64 MiB physical) so no
    # vmem_limit_bytes override is needed.
    max_tile_bytes = 3 * 1024 * 1024
    max_rows_by_vmem = max(packing, max_tile_bytes // max(1, d * itemsize))
    tile = min(1024, max_rows_by_vmem)
    # never make the block larger than the (packing-rounded) row count
    rows_padded = ((rows + packing - 1) // packing) * packing
    tile = min(tile, rows_padded)
    # round down to a packing multiple
    tile = max(packing, (tile // packing) * packing)
    return tile


def layer_normalization(x, alpha, bias, *, eps=1e-6):
    """Pallas LayerNormalization over the last axis of x (batch, seq, d_model)."""
    b, s, d = x.shape
    assert d > 1, "unbiased std divides by (d_model - 1); need d_model > 1"
    rows = b * s
    x2 = x.reshape(rows, d)

    row_tile = _choose_row_tile(rows, d, x.dtype)
    grid = (pl.cdiv(rows, row_tile),)

    kernel = functools.partial(_layernorm_kernel, eps=eps, d_model=d)

    out = pl.pallas_call(
        kernel,
        out_shape=jax.ShapeDtypeStruct((rows, d), x.dtype),
        grid=grid,
        in_specs=[
            pl.BlockSpec(memory_space=pltpu.SMEM),  # alpha (scalar)
            pl.BlockSpec(memory_space=pltpu.SMEM),  # bias  (scalar)
            pl.BlockSpec((row_tile, d), lambda i: (i, 0)),
        ],
        out_specs=pl.BlockSpec((row_tile, d), lambda i: (i, 0)),
        compiler_params=pltpu.CompilerParams(
            dimension_semantics=("parallel",)
        ),
    )(alpha, bias, x2)

    return out.reshape(b, s, d)


def encoder_forward(x, mask, encoder_blocks, alpha, bias, *, eps=1e-6):
    """Mirrors Encoder.forward: run blocks sequentially, then LayerNormalization."""
    for block in encoder_blocks:
        x = block(x, mask)
    return layer_normalization(x, alpha, bias, eps=eps)


def _reference_layernorm(x, alpha, bias, eps=1e-6):
    x = x.astype(jnp.float32)
    mean = jnp.mean(x, axis=-1, keepdims=True)
    # unbiased std, matching torch.Tensor.std default
    var = jnp.sum((x - mean) ** 2, axis=-1, keepdims=True) / (x.shape[-1] - 1)
    std = jnp.sqrt(var)
    return alpha[0] * (x - mean) / (std + eps) + bias[0]


if __name__ == "__main__":
    key = jax.random.PRNGKey(0)
    batch, seq, d_model = 2, 8, 32

    kx, _ = jax.random.split(key)
    x = jax.random.normal(kx, (batch, seq, d_model), dtype=jnp.float32)
    mask = jnp.ones((batch, 1, 1, seq), dtype=jnp.float32)  # unused by empty block list

    # LayerNormalization params: nn.Parameter(torch.ones(1)) / torch.zeros(1)
    alpha = jnp.ones((1,), dtype=jnp.float32)
    bias = jnp.zeros((1,), dtype=jnp.float32)

    encoder_blocks = []  # opaque in the reference; see TODO above

    out = encoder_forward(x, mask, encoder_blocks, alpha, bias)
    out = jax.block_until_ready(out)

    ref = _reference_layernorm(x, alpha, bias)
    assert out.shape == (batch, seq, d_model)
    assert jnp.allclose(out, ref, atol=1e-5, rtol=1e-5), "mismatch vs reference"

    print("KERNEL_OK")
</pallas_src>

<mosaic_0001>
module attributes {stable_mosaic.version = 11 : i64} {
  func.func @_layernorm_kernel(%arg0: i32, %arg1: memref<1xf32, #tpu.memory_space<smem>>, %arg2: memref<1xf32, #tpu.memory_space<smem>>, %arg3: memref<16x32xf32, #tpu.memory_space<vmem>>, %arg4: memref<16x32xf32, #tpu.memory_space<vmem>>) attributes {dimension_semantics = [#tpu.dimension_semantics<parallel>], iteration_bounds = array<i64: 1>, scalar_prefetch = 0 : i64, scratch_operands = 0 : i64, tpu.core_type = #tpu.core_type<tc>, window_params = [{transform_indices = @transform_0, window_bounds = array<i64: 1>}, {transform_indices = @transform_1, window_bounds = array<i64: 1>}, {transform_indices = @transform_2, window_bounds = array<i64: 16, 32>}, {transform_indices = @transform_3, window_bounds = array<i64: 16, 32>}]} {
    %c0 = arith.constant 0 : index
    %c0_0 = arith.constant 0 : index
    %0 = vector.load %arg3[%c0, %c0_0] : memref<16x32xf32, #tpu.memory_space<vmem>>, vector<16x32xf32>
    %cst = arith.constant dense<0.000000e+00> : vector<16xf32>
    %1 = vector.multi_reduction <add>, %0, %cst [1] : vector<16x32xf32> to vector<16xf32>
    %2 = vector.shape_cast %1 : vector<16xf32> to vector<16x1xf32>
    %3 = arith.mulf %0, %0 : vector<16x32xf32>
    %cst_1 = arith.constant dense<0.000000e+00> : vector<16xf32>
    %4 = vector.multi_reduction <add>, %3, %cst_1 [1] : vector<16x32xf32> to vector<16xf32>
    %5 = vector.shape_cast %4 : vector<16xf32> to vector<16x1xf32>
    %cst_2 = arith.constant 3.125000e-02 : f32
    %6 = vector.broadcast %cst_2 : f32 to vector<16x1xf32>
    %7 = arith.mulf %2, %6 : vector<16x1xf32>
    %8 = arith.mulf %2, %7 : vector<16x1xf32>
    %9 = arith.subf %5, %8 : vector<16x1xf32>
    %cst_3 = arith.constant 0.0322580636 : f32
    %10 = vector.broadcast %cst_3 : f32 to vector<16x1xf32>
    %11 = arith.mulf %9, %10 : vector<16x1xf32>
    %cst_4 = arith.constant 0.000000e+00 : f32
    %12 = vector.broadcast %cst_4 : f32 to vector<16x1xf32>
    %13 = arith.maximumf %11, %12 : vector<16x1xf32>
    %14 = math.sqrt %13 : vector<16x1xf32>
    %cst_5 = arith.constant 9.99999997E-7 : f32
    %15 = vector.broadcast %cst_5 : f32 to vector<16x1xf32>
    %16 = arith.addf %14, %15 : vector<16x1xf32>
    %17 = tpu.reciprocal %16 : vector<16x1xf32> -> vector<16x1xf32>
    %c0_6 = arith.constant 0 : index
    %18 = memref.load %arg1[%c0_6] : memref<1xf32, #tpu.memory_space<smem>>
    %c0_7 = arith.constant 0 : index
    %19 = memref.load %arg2[%c0_7] : memref<1xf32, #tpu.memory_space<smem>>
    %20 = vector.broadcast %18 : f32 to vector<16x1xf32>
    %21 = arith.mulf %20, %17 : vector<16x1xf32>
    %22 = arith.mulf %7, %21 : vector<16x1xf32>
    %23 = vector.broadcast %19 : f32 to vector<16x1xf32>
    %24 = arith.subf %23, %22 : vector<16x1xf32>
    %25 = vector.broadcast %21 : vector<16x1xf32> to vector<16x32xf32>
    %26 = arith.mulf %0, %25 : vector<16x32xf32>
    %27 = vector.broadcast %24 : vector<16x1xf32> to vector<16x32xf32>
    %28 = arith.addf %26, %27 : vector<16x32xf32>
    %c0_8 = arith.constant 0 : index
    %c0_9 = arith.constant 0 : index
    %29 = vector.load %arg4[%c0_8, %c0_9] : memref<16x32xf32, #tpu.memory_space<vmem>>, vector<16x32xf32>
    tpu.vector_store %arg4[%c0_8, %c0_9], %28 {strides = array<i32>} : memref<16x32xf32, #tpu.memory_space<vmem>>, vector<16x32xf32>,
    return
  }
  func.func @transform_0(%arg0: i32) -> i32 {
    %c0_i32 = arith.constant 0 : i32
    %c0_i32_0 = arith.constant 0 : i32
    return %c0_i32 : i32
  }
  func.func @transform_1(%arg0: i32) -> i32 {
    %c0_i32 = arith.constant 0 : i32
    %c0_i32_0 = arith.constant 0 : i32
    return %c0_i32 : i32
  }
  func.func @transform_2(%arg0: i32) -> (i32, i32) {
    %c0_i32 = arith.constant 0 : i32
    %c0_i32_0 = arith.constant 0 : i32
    return %arg0, %c0_i32 : i32, i32
  }
  func.func @transform_3(%arg0: i32) -> (i32, i32) {
    %c0_i32 = arith.constant 0 : i32
    %c0_i32_0 = arith.constant 0 : i32
    return %arg0, %c0_i32 : i32, i32
  }
}

</mosaic_0001>

<bundles_post_ra>
// kernel: tpu_custom_call.1
= control target key start
LH: loop header
LB: loop body
LE: loop exit
PB: predicated region body
PF: predicated region fallthrough
CT: control target
= control target key end

     0   :  { %10 = vsyncpa [#allocation5], 0  ;;  %s213_s0 = inlined_call_operand.<no memory space> [shape: f32[1], index: 0, kind: input, shape index: {}]   ;;  %s214_s1 = inlined_call_operand.<no memory space> [shape: f32[1], index: 1, kind: input, shape index: {}]   ;;  %s215_s2 = inlined_call_operand.hbm [shape: f32[16,32], index: 2, kind: input, shape index: {}]   ;;  %s216_s3 = inlined_call_operand.hbm [shape: f32[16,32], index: 3, kind: output, shape index: {}]  }
   0x1   :  { %11 = vsyncpa [#allocation6], 0  ;;  %s165_s12 = smov [#allocation4]  }
   0x2   :  { %s21_s13 = sshll.u32 %s165_s12, 4  ;;  %s22_s13 = int_to_ptr.vmem [resolvable:$true] %s21_s13 }
   0x3   :  { %s129_s14 = scalar_lea.vmem %s22_s13, 256  ;;  %p134_p1 = scmp.lt.s32.totalorder %s22_s13, %s22_s13 }
   0x4   :  { %p130_p0 = scmp.ne.s32.totalorder %s22_s13, %s129_s14  ;;  %p135_p2 = scmp.lt.s32.totalorder %s129_s14, %s129_s14 }
   0x6   :  { %p136_p3 = por %p135_p2, %p134_p1 }
   0x8   :  { %p137_p4 = pnand %p136_p3, %p130_p0 }
   0xa   :  { %140 = shalt.err (!%p137_p4)
}
   0xb   :  { %s166_s15 = smov 128   ;;  %s167_s16 = smov 8  }
   0xc   :  { %27 = dma.hbm_to_vmem [thread:$0]  %s215_s2, 256, %s22_s13, [#allocation5], %s166_s15, %s166_s15, %s167_s16  }
   0xd   :  { %161 = dma.done.wait [#allocation5], 256  }
   0xe   :  { %162 = vsyncadd [#allocation5], 4294967040  ;;  %vm33_vm0 = vcmask 261120   ;;  %v31_v0 = vld [vmem:[#allocation4] sm:$0xff]  ;;  %v32_v1 = vld [vmem:[#allocation4 + $0x8] sm:$0xff]  ;;  %v78_v34 = vstv %s213_s0  ;;  %v83_v37 = vstv %s214_s1  ;;  %s168_s22 = smov [#allocation7]  }
   0xf   :  { %v34_v2 = vsel %vm33_vm0, %v31_v0, 0.0  ;;  %v40_v3 = vmul.f32 %v31_v0, %v31_v0  ;;  %v41_v4 = vmul.f32 %v32_v1, %v32_v1  ;;  %v37_v6 = vsel %vm33_vm0, %v32_v1, 0.0  ;;  %s97_s23 = sshll.u32 %s168_s22, 4  ;;  %s98_s23 = int_to_ptr.vmem [resolvable:$true] %s97_s23 }
  0x10   :  { %35 = vadd.xlane.f32.xlu0 %v34_v2  ;;  %s141_s0 = scalar_lea.vmem %s98_s23, 256  ;;  %p146_p6 = scmp.lt.s32.totalorder %s98_s23, %s98_s23 }
  0x11   :  { %v42_v5 = vsel %vm33_vm0, %v40_v3, 0.0  ;;  %v45_v7 = vsel %vm33_vm0, %v41_v4, 0.0  ;;  %p142_p5 = scmp.ne.s32.totalorder %s98_s23, %s141_s0  ;;  %p147_p7 = scmp.lt.s32.totalorder %s141_s0, %s141_s0 }
  0x12   :  { %43 = vadd.xlane.f32.xlu1 %v42_v5 }
  0x13   :  { %p148_p8 = por %p147_p7, %p146_p6 }
  0x14   :  { %38 = vadd.xlane.f32.xlu0 %v37_v6 }
  0x15   :  { %p149_p9 = pnand %p148_p8, %p142_p5 }
  0x16   :  { %46 = vadd.xlane.f32.xlu1 %v45_v7 }
  0x99   :  { %v36_v8 = vpop.xlane.xlu0 %35 }
  0x9a   :  { %v48_v9 = vmul.f32 0.03125, %v36_v8 }
  0x9b   :  { %v44_v10 = vpop.xlane.xlu1 %43 }
  0x9c   :  { %v50_v11 = vmul.f32 %v48_v9, %v36_v8 }
  0x9d   :  { %v39_v12 = vpop.xlane.xlu0 %38 }
  0x9e   :  { %v52_v13 = vsub.f32 %v44_v10, %v50_v11  ;;  %v49_v14 = vmul.f32 0.03125, %v39_v12 }
  0x9f   :  { %v47_v15 = vpop.xlane.xlu1 %46 }
  0xa0   :  { %v54_v16 = vmul.f32 0.032258064, %v52_v13  ;;  %v51_v17 = vmul.f32 %v49_v14, %v39_v12 }
  0xa2   :  { %v56_v18 = vmax.f32 %v54_v16, 0.0  ;;  %v53_v19 = vsub.f32 %v47_v15, %v51_v17 }
  0xa4   :  { %113 = vrsqrt.f32 %v56_v18  ;;  %v55_v20 = vmul.f32 0.032258064, %v53_v19  ;;  %vm60_vm1 = vcmp.eq.f32.partialorder %v56_v18, inf  ;;  %v63_v24 = vand.u32 2147483648, %v56_v18 }
  0xa5   :  { %vm62_vm2 = vcmp.eq.f32.partialorder %v56_v18, 0.0 }
  0xa6   :  { %v57_v21 = vmax.f32 %v55_v20, 0.0 }
  0xa8   :  { %115 = vrsqrt.f32 %v57_v21  ;;  %vm67_vm3 = vcmp.eq.f32.partialorder %v57_v21, inf  ;;  %v70_v30 = vand.u32 2147483648, %v57_v21  ;;  %vm69_vm4 = vcmp.eq.f32.partialorder %v57_v21, 0.0 }
  0xb1   :  { %v114_v22 = vpop.eup %113 }
  0xb2   :  { %v59_v23 = vmul.f32 %v114_v22, %v56_v18 }
  0xb4   :  { %v61_v25 = vsel %vm60_vm1, %v56_v18, %v59_v23 }
  0xb5   :  { %v64_v26 = vsel %vm62_vm2, %v63_v24, %v61_v25  ;;  %v116_v27 = vpop.eup %115 }
  0xb6   :  { %v72_v28 = vadd.f32 1e-06, %v64_v26  ;;  %v66_v29 = vmul.f32 %v116_v27, %v57_v21 }
  0xb8   :  { %117 = vrcp.f32 %v72_v28  ;;  %v68_v31 = vsel %vm67_vm3, %v57_v21, %v66_v29 }
  0xb9   :  { %v71_v32 = vsel %vm69_vm4, %v70_v30, %v68_v31 }
  0xba   :  { %v73_v33 = vadd.f32 1e-06, %v71_v32 }
  0xbc   :  { %119 = vrcp.f32 %v73_v33 }
  0xc5   :  { %v118_v35 = vpop.eup %117 }
  0xc6   :  { %v79_v36 = vmul.f32 %v118_v35, %v78_v34 }
  0xc8   :  { %v81_v38 = vmul.f32 %v79_v36, %v48_v9  ;;  %v86_v41 = vmul.f32 %v79_v36, %v31_v0 }
  0xc9   :  { %v120_v39 = vpop.eup %119 }
  0xca   :  { %v84_v40 = vsub.f32 %v83_v37, %v81_v38  ;;  %v80_v42 = vmul.f32 %v120_v39, %v78_v34 }
  0xcc   :  { %v88_v43 = vadd.f32 %v86_v41, %v84_v40  ;;  %v82_v44 = vmul.f32 %v80_v42, %v49_v14  ;;  %v87_v46 = vmul.f32 %v80_v42, %v32_v1 }
  0xce   :  { %90 = vst.msk [vmem:[#allocation7] sm:$0xff] %vm33_vm0, %v88_v43  ;;  %v85_v45 = vsub.f32 %v83_v37, %v82_v44 }
  0xd0   :  { %v89_v47 = vadd.f32 %v87_v46, %v85_v45 }
  0xd2   :  { %91 = vst.msk [vmem:[#allocation7 + $0x8] sm:$0xff] %vm33_vm0, %v89_v47 }
  0xd3   :  { %152 = shalt.err (!%p149_p9)
}
  0xd4   :  { %103 = dma.vmem_to_hbm [thread:$0]  %s98_s23, 256, %s216_s3, [#allocation6], %s166_s15, %s166_s15, %s167_s16  }
  0xd5   :  { %163 = dma.done.wait [#allocation6], 256  }
  0xd6   :  { %164 = vsyncadd [#allocation6], 4294967040 }
  0xd7   :  { %107 = vsyncpa [#allocation5], 1 }
  0xd8   :  { %108 = vsyncpa [#allocation6], 1 }

</bundles_post_ra>
